<compile_context>
chip_gen: v5e
topology: v5e:2x2
jax: 0.10.0
libtpu: 0.0.40
codegen_flags: <defaults>
</compile_context>

<pallas_src>
import jax
import jax.numpy as jnp
from jax.experimental import pallas as pl
from jax.experimental.pallas import tpu as pltpu


# ---------------------------------------------------------------------------
# helpers
# ---------------------------------------------------------------------------
def _round_up(v, m):
    return ((v + m - 1) // m) * m


def _pad2(a, rows, cols, dtype):
    a = a.astype(dtype)
    return jnp.pad(a, ((0, rows - a.shape[0]), (0, cols - a.shape[1])))


def _vmem_budget(tile_bytes):
    # double-buffered pipelined tiles + compiler scratch headroom; cap at v7x's 64 MiB
    return int(min(64 << 20, max(16 << 20, 2 * tile_bytes + (8 << 20))))


# ---------------------------------------------------------------------------
# fused kernel (small N): everything VMEM-resident, grid=(1,)
# out = sigmoid(adj @ (sigmoid(adj @ (x @ W1) + b1) @ W2) + b2)
# ---------------------------------------------------------------------------
def _gcn_fused_kernel(adj_ref, x_ref, w1_ref, b1_ref, w2_ref, b2_ref, out_ref):
    adj = adj_ref[...]                                            # bf16 [Np, Np]
    # layer 1 (relu(sigmoid(.)) == sigmoid(.), relu omitted)
    y1 = jnp.dot(x_ref[...], w1_ref[...], preferred_element_type=jnp.float32)
    h = jnp.dot(adj, y1.astype(jnp.bfloat16), preferred_element_type=jnp.float32)
    h = jax.nn.sigmoid(h + b1_ref[...])
    # NOTE(padding): padded columns of h are sigmoid(0)=0.5 and padded rows are
    # sigmoid(b1); both are neutralized by zero-padded W2 rows / zero-padded adj
    # columns.  Do NOT insert non-zero-preserving ops between the layers here.
    y2 = jnp.dot(h.astype(jnp.bfloat16), w2_ref[...], preferred_element_type=jnp.float32)
    z = jnp.dot(adj, y2.astype(jnp.bfloat16), preferred_element_type=jnp.float32)
    out_ref[...] = jax.nn.sigmoid(z + b2_ref[...])


def _gcn_fused(adj_bf, x_bf, w1_bf, b1_p, w2_bf, b2_p):
    Np = adj_bf.shape[0]
    Fp = x_bf.shape[1]
    Hp = w1_bf.shape[1]
    Lp = w2_bf.shape[1]

    operand_bytes = sum(int(a.size) * a.dtype.itemsize
                        for a in (adj_bf, x_bf, w1_bf, b1_p, w2_bf, b2_p))
    interm_bytes = 4 * Np * max(Fp, Hp, Lp) * 4      # f32 intermediates (y1, h, y2, z)
    out_bytes = Np * Lp * 4

    return pl.pallas_call(
        _gcn_fused_kernel,
        out_shape=jax.ShapeDtypeStruct((Np, Lp), jnp.float32),
        grid_spec=pltpu.PrefetchScalarGridSpec(
            num_scalar_prefetch=0,
            grid=(1,),
            in_specs=[
                pl.BlockSpec((Np, Np), lambda i: (0, 0)),   # adj (bf16, resident)
                pl.BlockSpec((Np, Fp), lambda i: (0, 0)),   # x   (bf16)
                pl.BlockSpec((Fp, Hp), lambda i: (0, 0)),   # W1  (bf16)
                pl.BlockSpec((1, Hp), lambda i: (0, 0)),    # b1  (f32)
                pl.BlockSpec((Hp, Lp), lambda i: (0, 0)),   # W2  (bf16)
                pl.BlockSpec((1, Lp), lambda i: (0, 0)),    # b2  (f32)
            ],
            out_specs=pl.BlockSpec((Np, Lp), lambda i: (0, 0)),
        ),
        compiler_params=pltpu.CompilerParams(
            dimension_semantics=("arbitrary",),
            vmem_limit_bytes=_vmem_budget(operand_bytes + interm_bytes + out_bytes),
        ),
    )(adj_bf, x_bf, w1_bf, b1_p, w2_bf, b2_p)


# ---------------------------------------------------------------------------
# tiled path (large N)
# kernel A: Y = X @ W  (feature transform, hoisted out of the aggregation loop)
# kernel B: out = sigmoid(adj @ Y + b)  (streamed adj, f32 accumulator)
# ---------------------------------------------------------------------------
def _xw_kernel(x_ref, w_ref, y_ref):
    y_ref[...] = jnp.dot(x_ref[...], w_ref[...],
                         preferred_element_type=jnp.float32).astype(y_ref.dtype)


def _feature_transform(x_bf, w_bf, *, tm):
    """Y = X @ W ; bf16 in, bf16 out (f32 MXU accumulation)."""
    Np, In = x_bf.shape
    Out = w_bf.shape[1]
    tile_bytes = tm * In * 2 + In * Out * 2 + tm * Out * 2
    return pl.pallas_call(
        _xw_kernel,
        out_shape=jax.ShapeDtypeStruct((Np, Out), jnp.bfloat16),
        grid_spec=pltpu.PrefetchScalarGridSpec(
            num_scalar_prefetch=0,
            grid=(Np // tm,),
            in_specs=[
                pl.BlockSpec((tm, In), lambda i: (i, 0)),
                pl.BlockSpec((In, Out), lambda i: (0, 0)),   # W resident
            ],
            out_specs=pl.BlockSpec((tm, Out), lambda i: (i, 0)),
        ),
        compiler_params=pltpu.CompilerParams(
            dimension_semantics=("parallel",),
            vmem_limit_bytes=_vmem_budget(tile_bytes),
        ),
    )(x_bf, w_bf)


def _agg_kernel(adj_ref, y_ref, b_ref, out_ref, acc_ref):
    k = pl.program_id(1)

    @pl.when(k == 0)
    def _init():
        acc_ref[...] = jnp.zeros_like(acc_ref)

    # adj and Y are already bf16 -> no per-step converts; pure MXU accumulation.
    acc_ref[...] += jnp.dot(adj_ref[...], y_ref[...],
                            preferred_element_type=jnp.float32)

    @pl.when(k == pl.num_programs(1) - 1)
    def _finalize():
        out_ref[...] = jax.nn.sigmoid(acc_ref[...] + b_ref[...]).astype(out_ref.dtype)


def _aggregate(adj_bf, y_bf, b_p, *, tm, tk, out_dtype):
    """sigmoid(adj @ Y + b). adj:[Np,Np] bf16, Y:[Np,Out] bf16, b:[1,Out] f32."""
    Np = adj_bf.shape[0]
    Out = y_bf.shape[1]
    out_itemsize = jnp.dtype(out_dtype).itemsize
    tile_bytes = (tm * tk * 2          # adj tile (streamed)
                  + tk * Out * 2       # Y rows
                  + Out * 4            # bias
                  + tm * Out * out_itemsize   # output tile
                  + tm * Out * 4)      # f32 accumulator
    return pl.pallas_call(
        _agg_kernel,
        out_shape=jax.ShapeDtypeStruct((Np, Out), out_dtype),
        grid_spec=pltpu.PrefetchScalarGridSpec(
            num_scalar_prefetch=0,
            grid=(Np // tm, Np // tk),
            in_specs=[
                pl.BlockSpec((tm, tk), lambda i, k: (i, k)),    # adj tile
                pl.BlockSpec((tk, Out), lambda i, k: (k, 0)),   # Y rows for this k
                pl.BlockSpec((1, Out), lambda i, k: (0, 0)),    # bias (resident)
            ],
            out_specs=pl.BlockSpec((tm, Out), lambda i, k: (i, 0)),
            scratch_shapes=[pltpu.VMEM((tm, Out), jnp.float32)],
        ),
        compiler_params=pltpu.CompilerParams(
            dimension_semantics=("parallel", "arbitrary"),
            vmem_limit_bytes=_vmem_budget(tile_bytes),
        ),
    )(adj_bf, y_bf, b_p)


# ---------------------------------------------------------------------------
# wrapper: pad to lane-dense shapes, pick fused vs tiled path, slice back
# ---------------------------------------------------------------------------
def gcn_forward(x, adj, w1, b1, w2, b2, *, force_tiled=False):
    N, F = x.shape
    H = w1.shape[1]
    L = w2.shape[1]

    Fp = _round_up(F, 128)
    Hp = _round_up(H, 128)
    Lp = _round_up(L, 128)
    Np128 = _round_up(N, 128)

    fused = (not force_tiled) and Np128 <= 1024 and max(Fp, Hp, Lp) <= 512

    if fused:
        Np = Np128
        adj_bf = _pad2(adj, Np, Np, jnp.bfloat16)
        x_bf = _pad2(x, Np, Fp, jnp.bfloat16)
        w1_bf = _pad2(w1, Fp, Hp, jnp.bfloat16)
        w2_bf = _pad2(w2, Hp, Lp, jnp.bfloat16)
        b1_p = _pad2(b1, 1, Hp, jnp.float32)
        b2_p = _pad2(b2, 1, Lp, jnp.float32)
        z_p = _gcn_fused(adj_bf, x_bf, w1_bf, b1_p, w2_bf, b2_p)
        return z_p[:N, :L]

    # tiled path: pick a tile so the row ("parallel") axis has >= 2 tiles (v7x megacore)
    if Np128 >= 1024:
        tm = 512
    elif Np128 >= 512:
        tm = 256
    else:
        tm = 128
    Np = _round_up(N, tm)
    tk = tm

    adj_bf = _pad2(adj, Np, Np, jnp.bfloat16)
    x_bf = _pad2(x, Np, Fp, jnp.bfloat16)
    w1_bf = _pad2(w1, Fp, Hp, jnp.bfloat16)
    w2_bf = _pad2(w2, Hp, Lp, jnp.bfloat16)
    b1_p = _pad2(b1, 1, Hp, jnp.float32)
    b2_p = _pad2(b2, 1, Lp, jnp.float32)

    # layer 1: Y1 = X @ W1 (hoisted), h = sigmoid(adj @ Y1 + b1) stored in bf16
    # (relu(sigmoid(.)) == sigmoid(.), relu omitted)
    y1 = _feature_transform(x_bf, w1_bf, tm=tm)
    h = _aggregate(adj_bf, y1, b1_p, tm=tm, tk=tk, out_dtype=jnp.bfloat16)
    # NOTE(padding): padded cols of h are 0.5 and padded rows are sigmoid(b1); they
    # are neutralized by zero-padded W2 rows / zero-padded adj columns below.
    # layer 2: Y2 = h @ W2 (hoisted), out = sigmoid(adj @ Y2 + b2) in f32
    y2 = _feature_transform(h, w2_bf, tm=tm)
    z_p = _aggregate(adj_bf, y2, b2_p, tm=tm, tk=tk, out_dtype=jnp.float32)
    return z_p[:N, :L]


# ---------------------------------------------------------------------------
# test harness
# ---------------------------------------------------------------------------
def build_normalized_adj(N):
    # deterministic ring graph with self loops, symmetrically normalized
    eye = jnp.eye(N, dtype=jnp.float32)
    ring = jnp.roll(eye, 1, axis=1) + jnp.roll(eye, -1, axis=1)
    a = eye + ring
    deg = jnp.sum(a, axis=1)
    d_inv_sqrt = 1.0 / jnp.sqrt(deg)
    return a * d_inv_sqrt[:, None] * d_inv_sqrt[None, :]


def reference_forward(x, adj, w1, b1, w2, b2):
    h = adj @ (x @ w1) + b1
    h = jnp.maximum(jax.nn.sigmoid(h), 0.0)   # relu kept to mirror PyTorch exactly
    z = adj @ (h @ w2) + b2
    return jax.nn.sigmoid(z)


def _make_inputs(key, N, F, H, L):
    kx, kw1, kb1, kw2, kb2 = jax.random.split(key, 5)
    x = jax.random.normal(kx, (N, F), dtype=jnp.float32)
    adj = build_normalized_adj(N)
    w1 = jax.random.normal(kw1, (F, H), dtype=jnp.float32) * (1.0 / jnp.sqrt(F))
    b1 = jax.random.normal(kb1, (1, H), dtype=jnp.float32) * 0.01
    w2 = jax.random.normal(kw2, (H, L), dtype=jnp.float32) * (1.0 / jnp.sqrt(H))
    b2 = jax.random.normal(kb2, (1, L), dtype=jnp.float32) * 0.01
    return x, adj, w1, b1, w2, b2


if __name__ == "__main__":
    key = jax.random.PRNGKey(0)
    k1, k2 = jax.random.split(key)

    # small config (module-consistent: N nodes, n_feat -> n_hid -> n_latent): fused path
    N, F, H, L = 16, 32, 64, 16
    x, adj, w1, b1, w2, b2 = _make_inputs(k1, N, F, H, L)
    out = jax.block_until_ready(gcn_forward(x, adj, w1, b1, w2, b2))
    ref = reference_forward(x, adj, w1, b1, w2, b2)
    assert out.shape == (N, L)
    # bf16 matmul inputs (f32 accumulation) -> loosened tolerance vs pure-f32
    assert jnp.allclose(out, ref, atol=2e-2, rtol=2e-2), "fused path mismatch"

    # larger config exercising the tiled (streamed-adj) path
    N2, F2, H2, L2 = 300, 32, 64, 16
    x2, adj2, w12, b12, w22, b22 = _make_inputs(k2, N2, F2, H2, L2)
    out2 = jax.block_until_ready(
        gcn_forward(x2, adj2, w12, b12, w22, b22, force_tiled=True))
    ref2 = reference_forward(x2, adj2, w12, b12, w22, b22)
    assert out2.shape == (N2, L2)
    assert jnp.allclose(out2, ref2, atol=2e-2, rtol=2e-2), "tiled path mismatch"

    print("KERNEL_OK")
</pallas_src>

<mosaic_0001>
module attributes {stable_mosaic.version = 11 : i64} {
  func.func @_gcn_fused_kernel(%arg0: i32, %arg1: memref<128x128xbf16, #tpu.memory_space<vmem>>, %arg2: memref<128x128xbf16, #tpu.memory_space<vmem>>, %arg3: memref<128x128xbf16, #tpu.memory_space<vmem>>, %arg4: memref<1x128xf32, #tpu.memory_space<vmem>>, %arg5: memref<128x128xbf16, #tpu.memory_space<vmem>>, %arg6: memref<1x128xf32, #tpu.memory_space<vmem>>, %arg7: memref<128x128xf32, #tpu.memory_space<vmem>>) attributes {dimension_semantics = [#tpu.dimension_semantics<arbitrary>], iteration_bounds = array<i64: 1>, scalar_prefetch = 0 : i64, scratch_operands = 0 : i64, tpu.core_type = #tpu.core_type<tc>, window_params = [{pipeline_mode = #tpu.pipeline_mode<synchronous>, transform_indices = @transform_0, window_bounds = array<i64: 128, 128>}, {pipeline_mode = #tpu.pipeline_mode<synchronous>, transform_indices = @transform_1, window_bounds = array<i64: 128, 128>}, {pipeline_mode = #tpu.pipeline_mode<synchronous>, transform_indices = @transform_2, window_bounds = array<i64: 128, 128>}, {pipeline_mode = #tpu.pipeline_mode<synchronous>, transform_indices = @transform_3, window_bounds = array<i64: 1, 128>}, {pipeline_mode = #tpu.pipeline_mode<synchronous>, transform_indices = @transform_4, window_bounds = array<i64: 128, 128>}, {pipeline_mode = #tpu.pipeline_mode<synchronous>, transform_indices = @transform_5, window_bounds = array<i64: 1, 128>}, {pipeline_mode = #tpu.pipeline_mode<synchronous>, transform_indices = @transform_6, window_bounds = array<i64: 128, 128>}]} {
    %c0 = arith.constant 0 : index
    %c0_0 = arith.constant 0 : index
    %0 = vector.load %arg1[%c0, %c0_0] : memref<128x128xbf16, #tpu.memory_space<vmem>>, vector<128x128xbf16>
    %c0_1 = arith.constant 0 : index
    %c0_2 = arith.constant 0 : index
    %1 = vector.load %arg2[%c0_1, %c0_2] : memref<128x128xbf16, #tpu.memory_space<vmem>>, vector<128x128xbf16>
    %c0_3 = arith.constant 0 : index
    %c0_4 = arith.constant 0 : index
    %2 = vector.load %arg3[%c0_3, %c0_4] : memref<128x128xbf16, #tpu.memory_space<vmem>>, vector<128x128xbf16>
    %cst = arith.constant dense<0.000000e+00> : vector<128x128xf32>
    %3 = tpu.matmul %1, %2, %cst {dimension_numbers = #tpu.dot_dimension_numbers<[1], [0], [0], [1], [0, 0, 1, 1], [], []>} : vector<128x128xbf16>, vector<128x128xbf16>, vector<128x128xf32> -> vector<128x128xf32>
    %4 = arith.truncf %3 : vector<128x128xf32> to vector<128x128xbf16>
    %cst_5 = arith.constant dense<0.000000e+00> : vector<128x128xf32>
    %5 = tpu.matmul %0, %4, %cst_5 {dimension_numbers = #tpu.dot_dimension_numbers<[1], [0], [0], [1], [0, 0, 1, 1], [], []>} : vector<128x128xbf16>, vector<128x128xbf16>, vector<128x128xf32> -> vector<128x128xf32>
    %c0_6 = arith.constant 0 : index
    %c0_7 = arith.constant 0 : index
    %6 = vector.load %arg4[%c0_6, %c0_7] : memref<1x128xf32, #tpu.memory_space<vmem>>, vector<1x128xf32>
    %7 = vector.broadcast %6 : vector<1x128xf32> to vector<128x128xf32>
    %8 = arith.addf %5, %7 : vector<128x128xf32>
    %9 = arith.negf %8 : vector<128x128xf32>
    %10 = math.exp %9 : vector<128x128xf32>
    %cst_8 = arith.constant 1.000000e+00 : f32
    %11 = vector.broadcast %cst_8 : f32 to vector<128x128xf32>
    %12 = arith.addf %11, %10 : vector<128x128xf32>
    %13 = arith.divf %11, %12 : vector<128x128xf32>
    %14 = arith.truncf %13 : vector<128x128xf32> to vector<128x128xbf16>
    %c0_9 = arith.constant 0 : index
    %c0_10 = arith.constant 0 : index
    %15 = vector.load %arg5[%c0_9, %c0_10] : memref<128x128xbf16, #tpu.memory_space<vmem>>, vector<128x128xbf16>
    %cst_11 = arith.constant dense<0.000000e+00> : vector<128x128xf32>
    %16 = tpu.matmul %14, %15, %cst_11 {dimension_numbers = #tpu.dot_dimension_numbers<[1], [0], [0], [1], [0, 0, 1, 1], [], []>} : vector<128x128xbf16>, vector<128x128xbf16>, vector<128x128xf32> -> vector<128x128xf32>
    %17 = arith.truncf %16 : vector<128x128xf32> to vector<128x128xbf16>
    %cst_12 = arith.constant dense<0.000000e+00> : vector<128x128xf32>
    %18 = tpu.matmul %0, %17, %cst_12 {dimension_numbers = #tpu.dot_dimension_numbers<[1], [0], [0], [1], [0, 0, 1, 1], [], []>} : vector<128x128xbf16>, vector<128x128xbf16>, vector<128x128xf32> -> vector<128x128xf32>
    %c0_13 = arith.constant 0 : index
    %c0_14 = arith.constant 0 : index
    %19 = vector.load %arg6[%c0_13, %c0_14] : memref<1x128xf32, #tpu.memory_space<vmem>>, vector<1x128xf32>
    %20 = vector.broadcast %19 : vector<1x128xf32> to vector<128x128xf32>
    %21 = arith.addf %18, %20 : vector<128x128xf32>
    %22 = arith.negf %21 : vector<128x128xf32>
    %23 = math.exp %22 : vector<128x128xf32>
    %cst_15 = arith.constant 1.000000e+00 : f32
    %24 = vector.broadcast %cst_15 : f32 to vector<128x128xf32>
    %25 = arith.addf %24, %23 : vector<128x128xf32>
    %26 = arith.divf %24, %25 : vector<128x128xf32>
    %c0_16 = arith.constant 0 : index
    %c0_17 = arith.constant 0 : index
    %27 = vector.load %arg7[%c0_16, %c0_17] : memref<128x128xf32, #tpu.memory_space<vmem>>, vector<128x128xf32>
    tpu.vector_store %arg7[%c0_16, %c0_17], %26 {strides = array<i32>} : memref<128x128xf32, #tpu.memory_space<vmem>>, vector<128x128xf32>,
    return
  }
  func.func @transform_0(%arg0: i32) -> (i32, i32) {
    %c0_i32 = arith.constant 0 : i32
    %c0_i32_0 = arith.constant 0 : i32
    %c0_i32_1 = arith.constant 0 : i32
    return %c0_i32, %c0_i32_0 : i32, i32
  }
  func.func @transform_1(%arg0: i32) -> (i32, i32) {
    %c0_i32 = arith.constant 0 : i32
    %c0_i32_0 = arith.constant 0 : i32
    %c0_i32_1 = arith.constant 0 : i32
    return %c0_i32, %c0_i32_0 : i32, i32
  }
  func.func @transform_2(%arg0: i32) -> (i32, i32) {
    %c0_i32 = arith.constant 0 : i32
    %c0_i32_0 = arith.constant 0 : i32
    %c0_i32_1 = arith.constant 0 : i32
    return %c0_i32, %c0_i32_0 : i32, i32
  }
  func.func @transform_3(%arg0: i32) -> (i32, i32) {
    %c0_i32 = arith.constant 0 : i32
    %c0_i32_0 = arith.constant 0 : i32
    %c0_i32_1 = arith.constant 0 : i32
    return %c0_i32, %c0_i32_0 : i32, i32
  }
  func.func @transform_4(%arg0: i32) -> (i32, i32) {
    %c0_i32 = arith.constant 0 : i32
    %c0_i32_0 = arith.constant 0 : i32
    %c0_i32_1 = arith.constant 0 : i32
    return %c0_i32, %c0_i32_0 : i32, i32
  }
  func.func @transform_5(%arg0: i32) -> (i32, i32) {
    %c0_i32 = arith.constant 0 : i32
    %c0_i32_0 = arith.constant 0 : i32
    %c0_i32_1 = arith.constant 0 : i32
    return %c0_i32, %c0_i32_0 : i32, i32
  }
  func.func @transform_6(%arg0: i32) -> (i32, i32) {
    %c0_i32 = arith.constant 0 : i32
    %c0_i32_0 = arith.constant 0 : i32
    %c0_i32_1 = arith.constant 0 : i32
    return %c0_i32, %c0_i32_0 : i32, i32
  }
}

</mosaic_0001>

<bundles_post_ra>
// kernel: tpu_custom_call.1
= control target key start
LH: loop header
LB: loop body
LE: loop exit
PB: predicated region body
PF: predicated region fallthrough
CT: control target
= control target key end

     0   :  { %11 = vsyncpa [#allocation3], 0  ;;  %s1892_s0 = inlined_call_operand.hbm [shape: bf16[128,128], index: 0, kind: input, shape index: {}]   ;;  %s1893_s1 = inlined_call_operand.hbm [shape: bf16[128,128], index: 1, kind: input, shape index: {}]   ;;  %s1894_s2 = inlined_call_operand.hbm [shape: bf16[128,128], index: 2, kind: input, shape index: {}]   ;;  %s1895_s3 = inlined_call_operand.vmem [shape: f32[1,128], index: 3, kind: input, shape index: {}]   ;;  %s1896_s4 = inlined_call_operand.hbm [shape: bf16[128,128], index: 4, kind: input, shape index: {}]   ;;  %s1897_s5 = inlined_call_operand.vmem [shape: f32[1,128], index: 5, kind: input, shape index: {}]   ;;  %s1898_s6 = inlined_call_operand.hbm [shape: f32[128,128], index: 6, kind: output, shape index: {}]  }
   0x1   :  { %12 = vsyncpa [#allocation6], 0 }
   0x2   :  { %13 = vsyncpa [#allocation9], 0 }
   0x3   :  { %14 = vsyncpa [#allocation4], 0  ;;  %s32_s23 = sshll.u32 %s1893_s1, 4  ;;  %s1675_s24 = smov [#allocation5]   ;;  %s33_s23 = int_to_ptr.hbm [resolvable:$true] %s32_s23 }
   0x4   :  { %s34_s25 = sshll.u32 %s1675_s24, 4  ;;  %s19_s28 = sshll.u32 %s1892_s0, 4  ;;  %s35_s25 = int_to_ptr.vmem [resolvable:$true] %s34_s25  ;;  %s20_s28 = int_to_ptr.hbm [resolvable:$true] %s19_s28 }
   0x5   :  { %s1676_s29 = smov 64   ;;  %s1677_s30 = smov 4  }
   0x6   :  { %40 = dma.hbm_to_vmem [thread:$0]  %s33_s23, 1024, %s35_s25, [#allocation6], %s1676_s29, %s1676_s29, %s1677_s30  }
   0x7   :  { %s1678_s7 = smov [#allocation2]   ;;  %s45_s11 = sshll.u32 %s1894_s2, 4  ;;  %s46_s11 = int_to_ptr.hbm [resolvable:$true] %s45_s11 }
   0x8   :  { %s21_s8 = sshll.u32 %s1678_s7, 4  ;;  %s60_s13 = sshll.u32 %s1896_s4, 4  ;;  %s22_s8 = int_to_ptr.vmem [resolvable:$true] %s21_s8  ;;  %s61_s13 = int_to_ptr.hbm [resolvable:$true] %s60_s13 }
   0x9   :  { %27 = dma.hbm_to_vmem [thread:$0]  %s20_s28, 1024, %s22_s8, [#allocation3], %s1676_s29, %s1676_s29, %s1677_s30  }
   0xa   :  { %s1679_s14 = smov [#allocation7]   ;;  %s1680_s0 = smov [#allocation8]  }
   0xb   :  { %s47_s15 = sshll.u32 %s1679_s14, 4  ;;  %s62_s16 = sshll.u32 %s1680_s0, 4  ;;  %s48_s15 = int_to_ptr.vmem [resolvable:$true] %s47_s15  ;;  %s63_s16 = int_to_ptr.vmem [resolvable:$true] %s62_s16 }
   0xc   :  { %53 = dma.hbm_to_vmem [thread:$0]  %s46_s11, 1024, %s48_s15, [#allocation6], %s1676_s29, %s1676_s29, %s1677_s30  }
   0xd   :  { %68 = dma.hbm_to_vmem [thread:$0]  %s61_s13, 1024, %s63_s16, [#allocation9], %s1676_s29, %s1676_s29, %s1677_s30  }
   0xe   :  { %1667 = dma.done.wait [#allocation3], 1024  }
   0xf   :  { %1668 = vsyncadd [#allocation3], 4294966272 }
  0x10   :  { %1669 = dma.done.wait [#allocation6], 2048  }
  0x11   :  { %1670 = vsyncadd [#allocation6], 4294965248 }
  0x12   :  { %1671 = dma.done.wait [#allocation9], 1024  }
  0x13   :  { %1672 = vsyncadd [#allocation9], 4294966272  ;;  %v1399_v0 = vld [vmem:[#allocation7 + $0x38] sm:$0xff]  ;;  %v1398_v1 = vld [vmem:[#allocation7 + $0x30] sm:$0xff]  ;;  %s1201_s21 = sshll.u32 %s1898_s6, 4  ;;  %s1682_s22 = smov 128   ;;  %s1202_s21 = int_to_ptr.hbm [resolvable:$true] %s1201_s21 }
  0x14   :  { %231 = vmatpush.bf16.msra.mxu0 %v1399_v0  ;;  %v1397_v2 = vld [vmem:[#allocation7 + $0x28] sm:$0xff]  ;;  %v1396_v3 = vld [vmem:[#allocation7 + $0x20] sm:$0xff]  ;;  %v1395_v4 = vld [vmem:[#allocation7 + $0x18] sm:$0xff]  ;;  %s1683_s23 = smov 8  }
  0x15   :  { %v1394_v5 = vld [vmem:[#allocation7 + $0x10] sm:$0xff]  ;;  %v1393_v6 = vld [vmem:[#allocation7 + $0x8] sm:$0xff]  ;;  %v1392_v7 = vld [vmem:[#allocation7] sm:$0xff] }
  0x16   :  { %v1384_v8 = vld [vmem:[#allocation5] sm:$0xff]  ;;  %v1385_v9 = vld [vmem:[#allocation5 + $0x8] sm:$0xff]  ;;  %v1386_v10 = vld [vmem:[#allocation5 + $0x10] sm:$0xff] }
  0x17   :  { %v1387_v11 = vld [vmem:[#allocation5 + $0x18] sm:$0xff]  ;;  %v1388_v12 = vld [vmem:[#allocation5 + $0x20] sm:$0xff]  ;;  %v1389_v13 = vld [vmem:[#allocation5 + $0x28] sm:$0xff] }
  0x18   :  { %232 = vmatpush.bf16.msra.mxu0 %v1398_v1  ;;  %v1390_v14 = vld [vmem:[#allocation5 + $0x30] sm:$0xff]  ;;  %v1391_v15 = vld [vmem:[#allocation5 + $0x38] sm:$0xff]  ;;  %v1731_v40 = vld [vmem:[#allocation2] sm:$0xff] }
  0x19   :  { %v1734_v41 = vld [vmem:[#allocation2 + $0x8] sm:$0xff]  ;;  %v1737_v42 = vld [vmem:[#allocation2 + $0x10] sm:$0xff]  ;;  %v1740_v43 = vld [vmem:[#allocation2 + $0x18] sm:$0xff] }
  0x1a   :  { %v1743_v44 = vld [vmem:[#allocation2 + $0x20] sm:$0xff]  ;;  %v1746_v45 = vld [vmem:[#allocation2 + $0x28] sm:$0xff]  ;;  %v1749_v46 = vld [vmem:[#allocation2 + $0x30] sm:$0xff] }
  0x1b   :  { %v1407_v47 = vld [vmem:[#allocation8 + $0x38] sm:$0xff]  ;;  %v1406_v48 = vld [vmem:[#allocation8 + $0x30] sm:$0xff]  ;;  %v1405_v50 = vld [vmem:[#allocation8 + $0x28] sm:$0xff] }
  0x1c   :  { %233 = vmatpush.bf16.msra.mxu0 %v1397_v2  ;;  %765 = vmatpush.bf16.msra.mxu2 %v1407_v47  ;;  %v1752_v49 = vld [vmem:[#allocation2 + $0x38] sm:$0xff]  ;;  %v1404_v51 = vld [vmem:[#allocation8 + $0x20] sm:$0xff]  ;;  %v1402_v53 = vld [vmem:[#allocation8 + $0x10] sm:$0xff] }
  0x1d   :  { %v1403_v52 = vld [vmem:[#allocation8 + $0x18] sm:$0xff]  ;;  %v1758_v54 = vld [vmem:[%s1895_s3] ss:$0 sm:$0xff]  ;;  %v1401_v56 = vld [vmem:[#allocation8 + $0x8] sm:$0xff] }
  0x1e   :  { %v1400_v59 = vld [vmem:[#allocation8] sm:$0xff] }
  0x20   :  { %234 = vmatpush.bf16.msra.mxu0 %v1396_v3  ;;  %766 = vmatpush.bf16.msra.mxu2 %v1406_v48 }
  0x24   :  { %235 = vmatpush.bf16.msra.mxu0 %v1395_v4  ;;  %767 = vmatpush.bf16.msra.mxu2 %v1405_v50 }
  0x28   :  { %236 = vmatpush.bf16.msra.mxu0 %v1394_v5  ;;  %768 = vmatpush.bf16.msra.mxu2 %v1404_v51 }
  0x2c   :  { %237 = vmatpush.bf16.msra.mxu0 %v1393_v6  ;;  %769 = vmatpush.bf16.msra.mxu2 %v1403_v52 }
  0x30   :  { %238 = vmatpush.bf16.msra.mxu0 %v1392_v7  ;;  %770 = vmatpush.bf16.msra.mxu2 %v1402_v53 }
  0x33   :  { %239 = vmatmul.bf16.vlgmr.msra.gmra.mxu0 %v1384_v8 }
  0x34   :  { %771 = vmatpush.bf16.msra.mxu2 %v1401_v56 }
  0x38   :  { %772 = vmatpush.bf16.msra.mxu2 %v1400_v59 }
  0x43   :  { %244 = vmatmul.bf16.gmra.mxu0 %v1385_v9 }
  0x53   :  { %249 = vmatmul.bf16.gmra.mxu0 %v1386_v10 }
  0x63   :  { %254 = vmatmul.bf16.gmra.mxu0 %v1387_v11 }
  0x73   :  { %259 = vmatmul.bf16.gmra.mxu0 %v1388_v12 }
  0x83   :  { %264 = vmatmul.bf16.gmra.mxu0 %v1389_v13 }
  0x93   :  { %269 = vmatmul.bf16.gmra.mxu0 %v1390_v14 }
  0xa3   :  { %274 = vmatmul.bf16.gmra.mxu0 %v1391_v15 }
  0xb0   :  { %v240_v16 = vpop.f32.mrf.mxu0 }
  0xb8   :  { %v242_v17 = vpop.f32.mrf.mxu0 }
  0xb9   :  { %v280_v18 = vpack.c.bf16 %v242_v17, %v240_v16 }
  0xc0   :  { %v245_v19 = vpop.f32.mrf.mxu0 }
  0xc8   :  { %v247_v20 = vpop.f32.mrf.mxu0 }
  0xc9   :  { %v281_v21 = vpack.c.bf16 %v247_v20, %v245_v19 }
  0xd0   :  { %v250_v22 = vpop.f32.mrf.mxu0 }
  0xd8   :  { %v252_v23 = vpop.f32.mrf.mxu0 }
  0xd9   :  { %v282_v24 = vpack.c.bf16 %v252_v23, %v250_v22 }
  0xe0   :  { %v255_v25 = vpop.f32.mrf.mxu0 }
  0xe8   :  { %v257_v26 = vpop.f32.mrf.mxu0 }
  0xe9   :  { %v283_v27 = vpack.c.bf16 %v257_v26, %v255_v25 }
  0xf0   :  { %v260_v28 = vpop.f32.mrf.mxu0 }
  0xf8   :  { %v262_v29 = vpop.f32.mrf.mxu0 }
  0xf9   :  { %v284_v39 = vpack.c.bf16 %v262_v29, %v260_v28 }
 0x100   :  { %v265_v30 = vpop.f32.mrf.mxu0 }
 0x108   :  { %v267_v31 = vpop.f32.mrf.mxu0 }
 0x109   :  { %v285_v38 = vpack.c.bf16 %v267_v31, %v265_v30 }
 0x110   :  { %v270_v32 = vpop.f32.mrf.mxu0 }
 0x118   :  { %v272_v33 = vpop.f32.mrf.mxu0 }
 0x119   :  { %v286_v37 = vpack.c.bf16 %v272_v33, %v270_v32 }
 0x120   :  { %v275_v34 = vpop.f32.mrf.mxu0 }
 0x128   :  { %v277_v35 = vpop.f32.mrf.mxu0 }
 0x129   :  { %v287_v36 = vpack.c.bf16 %v277_v35, %v275_v34 }
 0x12b   :  { %340 = vmatpush.bf16.msra.mxu1 %v287_v36 }
 0x12f   :  { %341 = vmatpush.bf16.msra.mxu1 %v286_v37 }
 0x133   :  { %342 = vmatpush.bf16.msra.mxu1 %v285_v38 }
 0x137   :  { %343 = vmatpush.bf16.msra.mxu1 %v284_v39 }
 0x13b   :  { %344 = vmatpush.bf16.msra.mxu1 %v283_v27 }
 0x13f   :  { %345 = vmatpush.bf16.msra.mxu1 %v282_v24 }
 0x143   :  { %346 = vmatpush.bf16.msra.mxu1 %v281_v21 }
 0x147   :  { %347 = vmatpush.bf16.msra.mxu1 %v280_v18 }
 0x14a   :  { %348 = vmatmul.bf16.vlgmr.msra.gmra.mxu1 %v1731_v40 }
 0x15a   :  { %353 = vmatmul.bf16.gmra.mxu1 %v1734_v41 }
 0x16a   :  { %358 = vmatmul.bf16.gmra.mxu1 %v1737_v42 }
 0x17a   :  { %363 = vmatmul.bf16.gmra.mxu1 %v1740_v43 }
 0x18a   :  { %368 = vmatmul.bf16.gmra.mxu1 %v1743_v44 }
 0x19a   :  { %373 = vmatmul.bf16.gmra.mxu1 %v1746_v45 }
 0x1aa   :  { %378 = vmatmul.bf16.gmra.mxu1 %v1749_v46 }
 0x1ba   :  { %383 = vmatmul.bf16.gmra.mxu1 %v1752_v49 }
 0x1c7   :  { %v349_v55 = vpop.f32.mrf.mxu1 }
 0x1c8   :  { %v350_v57 = vadd.f32 %v1758_v54, %v349_v55 }
 0x1ca   :  { %v1312_v58 = vmul.f32 -1.442695, %v350_v57 }
 0x1cc   :  { %1419 = vpow2.f32 %v1312_v58 }
 0x1cf   :  { %v351_v60 = vpop.f32.mrf.mxu1 }
 0x1d0   :  { %v352_v61 = vadd.f32 %v1758_v54, %v351_v60 }
 0x1d2   :  { %v1420_v62 = vpop.eup %1419  ;;  %v1313_v63 = vmul.f32 -1.442695, %v352_v61 }
 0x1d3   :  { %v437_v0 = vadd.f32 1.0, %v1420_v62 }
 0x1d4   :  { %1421 = vpow2.f32 %v1313_v63 }
 0x1d5   :  { %1423 = vrcp.f32 %v437_v0  ;;  %vm458_vm1 = vweird.f32 %v437_v0  ;;  %v462_v20 = vand.u32 2147483647, %v437_v0  ;;  %v464_v21 = vand.u32 2147483648, %v437_v0 }
 0x1d7   :  { %v354_v1 = vpop.f32.mrf.mxu1  ;;  %vm463_vm5 = vcmp.eq.f32.partialorder %v462_v20, 8.507059e+37  ;;  %v465_v33 = vor.u32 1.1754944e-38, %v464_v21 }
 0x1d8   :  { %v355_v2 = vadd.f32 %v1758_v54, %v354_v1 }
 0x1da   :  { %v1422_v3 = vpop.eup %1421  ;;  %v1314_v4 = vmul.f32 -1.442695, %v355_v2 }
 0x1db   :  { %v1424_v5 = vpop.eup %1423  ;;  %v438_v6 = vadd.f32 1.0, %v1422_v3 }
 0x1dc   :  { %1425 = vpow2.f32 %v1314_v4  ;;  %v454_v7 = vmul.f32 %v1424_v5, %v437_v0  ;;  %vm459_vm0 = vweird.f32 %v1424_v5 }
 0x1dd   :  { %1427 = vrcp.f32 %v438_v6  ;;  %v479_v22 = vand.u32 2147483648, %v438_v6  ;;  %v477_v25 = vand.u32 2147483647, %v438_v6  ;;  %vm1768_vm3 = vmor %vm458_vm1, %vm459_vm0  ;;  %vm473_vm4 = vweird.f32 %v438_v6 }
 0x1de   :  { %v455_v8 = vsub.f32 1.0, %v454_v7 }
 0x1df   :  { %v356_v9 = vpop.f32.mrf.mxu1  ;;  %v480_v34 = vor.u32 1.1754944e-38, %v479_v22  ;;  %vm478_vm7 = vcmp.eq.f32.partialorder %v477_v25, 8.507059e+37 }
 0x1e0   :  { %v357_v10 = vadd.f32 %v1758_v54, %v356_v9  ;;  %v456_v13 = vmul.f32 %v1424_v5, %v455_v8 }
 0x1e2   :  { %v1426_v11 = vpop.eup %1425  ;;  %v1315_v12 = vmul.f32 -1.442695, %v357_v10  ;;  %v457_v17 = vadd.f32 %v1424_v5, %v456_v13 }
 0x1e3   :  { %v1428_v14 = vpop.eup %1427  ;;  %v1764_v15 = vadd.f32 1.0, %v1426_v11 }
 0x1e4   :  { %1429 = vpow2.f32 %v1315_v12  ;;  %v469_v16 = vmul.f32 %v1428_v14, %v438_v6  ;;  %vm474_vm2 = vweird.f32 %v1428_v14  ;;  %v461_v29 = vsel %vm1768_vm3, %v1424_v5, %v457_v17 }
 0x1e5   :  { %1431 = vrcp.f32 %v1764_v15  ;;  %vm475_vm6 = vmor %vm473_vm4, %vm474_vm2  ;;  %v466_v37 = vsel %vm463_vm5, %v465_v33, %v461_v29  ;;  %vm488_vm9 = vweird.f32 %v1764_v15  ;;  %v492_v61 = vand.u32 2147483647, %v1764_v15 }
 0x1e6   :  { %v470_v18 = vsub.f32 1.0, %v469_v16  ;;  %v494_v62 = vand.u32 2147483648, %v1764_v15 }
 0x1e7   :  { %v359_v19 = vpop.f32.mrf.mxu1  ;;  %vm493_vm13 = vcmp.eq.f32.partialorder %v492_v61, 8.507059e+37 }
 0x1e8   :  { %v360_v23 = vadd.f32 %v1758_v54, %v359_v19  ;;  %v471_v24 = vmul.f32 %v1428_v14, %v470_v18  ;;  %v495_v10 = vor.u32 1.1754944e-38, %v494_v62 }
 0x1ea   :  { %v1430_v27 = vpop.eup %1429  ;;  %v1316_v28 = vmul.f32 -1.442695, %v360_v23  ;;  %v472_v30 = vadd.f32 %v1428_v14, %v471_v24 }
 0x1eb   :  { %v1432_v31 = vpop.eup %1431  ;;  %v440_v32 = vadd.f32 1.0, %v1430_v27 }
 0x1ec   :  { %1433 = vpow2.f32 %v1316_v28  ;;  %v476_v35 = vsel %vm475_vm6, %v1428_v14, %v472_v30  ;;  %v484_v36 = vmul.f32 %v1432_v31, %v1764_v15  ;;  %vm489_vm8 = vweird.f32 %v1432_v31 }
 0x1ed   :  { %1435 = vrcp.f32 %v440_v32  ;;  %v481_v38 = vsel %vm478_vm7, %v480_v34, %v476_v35  ;;  %v509_v63 = vand.u32 2147483648, %v440_v32  ;;  %v507_v2 = vand.u32 2147483647, %v440_v32  ;;  %vm1783_vm11 = vmor %vm488_vm9, %vm489_vm8 }
 0x1ee   :  { %v693_v39 = vpack.c.bf16 %v481_v38, %v466_v37  ;;  %v485_v47 = vsub.f32 1.0, %v484_v36  ;;  %vm503_vm12 = vweird.f32 %v440_v32 }
 0x1ef   :  { %v361_v48 = vpop.f32.mrf.mxu1  ;;  %v510_v11 = vor.u32 1.1754944e-38, %v509_v63  ;;  %vm508_vm15 = vcmp.eq.f32.partialorder %v507_v2, 8.507059e+37 }
 0x1f0   :  { %v362_v50 = vadd.f32 %v1758_v54, %v361_v48  ;;  %773 = vmatmul.bf16.vlgmr.msra.gmra.mxu2 %v693_v39  ;;  %v486_v53 = vmul.f32 %v1432_v31, %v485_v47 }
 0x1f2   :  { %v1434_v51 = vpop.eup %1433  ;;  %v1317_v52 = vmul.f32 -1.442695, %v362_v50  ;;  %v487_v58 = vadd.f32 %v1432_v31, %v486_v53 }
 0x1f3   :  { %v1436_v55 = vpop.eup %1435  ;;  %v1776_v56 = vadd.f32 1.0, %v1434_v51 }
 0x1f4   :  { %1437 = vpow2.f32 %v1317_v52  ;;  %v499_v57 = vmul.f32 %v1436_v55, %v440_v32  ;;  %vm504_vm10 = vweird.f32 %v1436_v55  ;;  %v491_v6 = vsel %vm1783_vm11, %v1432_v31, %v487_v58 }
 0x1f5   :  { %1439 = vrcp.f32 %v1776_v56  ;;  %vm505_vm14 = vmor %vm503_vm12, %vm504_vm10  ;;  %v496_v14 = vsel %vm493_vm13, %v495_v10, %v491_v6  ;;  %vm518_vm1 = vweird.f32 %v1776_v56  ;;  %v522_v29 = vand.u32 2147483647, %v1776_v56 }
 0x1f6   :  { %v500_v59 = vsub.f32 1.0, %v499_v57  ;;  %v524_v30 = vand.u32 2147483648, %v1776_v56 }
 0x1f7   :  { %v364_v60 = vpop.f32.mrf.mxu1  ;;  %vm523_vm5 = vcmp.eq.f32.partialorder %v522_v29, 8.507059e+37 }
 0x1f8   :  { %v365_v0 = vadd.f32 %v1758_v54, %v364_v60  ;;  %v501_v1 = vmul.f32 %v1436_v55, %v500_v59  ;;  %v525_v50 = vor.u32 1.1754944e-38, %v524_v30 }
 0x1fa   :  { %v1438_v4 = vpop.eup %1437  ;;  %v1318_v5 = vmul.f32 -1.442695, %v365_v0  ;;  %v502_v7 = vadd.f32 %v1436_v55, %v501_v1 }
 0x1fb   :  { %v1440_v8 = vpop.eup %1439  ;;  %v442_v9 = vadd.f32 1.0, %v1438_v4 }
 0x1fc   :  { %1441 = vpow2.f32 %v1318_v5  ;;  %v506_v12 = vsel %vm505_vm14, %v1436_v55, %v502_v7  ;;  %v514_v13 = vmul.f32 %v1440_v8, %v1776_v56  ;;  %vm519_vm0 = vweird.f32 %v1440_v8 }
 0x1fd   :  { %1443 = vrcp.f32 %v442_v9  ;;  %v511_v15 = vsel %vm508_vm15, %v510_v11, %v506_v12  ;;  %v539_v31 = vand.u32 2147483648, %v442_v9  ;;  %v537_v34 = vand.u32 2147483647, %v442_v9  ;;  %vm1798_vm3 = vmor %vm518_vm1, %vm519_vm0 }
 0x1fe   :  { %v694_v16 = vpack.c.bf16 %v511_v15, %v496_v14  ;;  %v515_v17 = vsub.f32 1.0, %v514_v13  ;;  %vm533_vm4 = vweird.f32 %v442_v9 }
 0x1ff   :  { %v366_v18 = vpop.f32.mrf.mxu1  ;;  %v540_v51 = vor.u32 1.1754944e-38, %v539_v31  ;;  %vm538_vm7 = vcmp.eq.f32.partialorder %v537_v34, 8.507059e+37 }
 0x200   :  { %v367_v19 = vadd.f32 %v1758_v54, %v366_v18  ;;  %778 = vmatmul.bf16.gmra.mxu2 %v694_v16  ;;  %v516_v22 = vmul.f32 %v1440_v8, %v515_v17 }
 0x202   :  { %v1442_v20 = vpop.eup %1441  ;;  %v1319_v21 = vmul.f32 -1.442695, %v367_v19  ;;  %v517_v26 = vadd.f32 %v1440_v8, %v516_v22 }
 0x203   :  { %v1444_v23 = vpop.eup %1443  ;;  %v1791_v24 = vadd.f32 1.0, %v1442_v20 }
 0x204   :  { %1445 = vpow2.f32 %v1319_v21  ;;  %v529_v25 = vmul.f32 %v1444_v23, %v442_v9  ;;  %vm534_vm2 = vweird.f32 %v1444_v23  ;;  %v521_v38 = vsel %vm1798_vm3, %v1440_v8, %v517_v26 }
 0x205   :  { %1447 = vrcp.f32 %v1791_v24  ;;  %vm535_vm6 = vmor %vm533_vm4, %vm534_vm2  ;;  %v526_v55 = vsel %vm523_vm5, %v525_v50, %v521_v38  ;;  %vm548_vm9 = vweird.f32 %v1791_v24  ;;  %v552_v6 = vand.u32 2147483647, %v1791_v24 }
 0x206   :  { %v530_v27 = vsub.f32 1.0, %v529_v25  ;;  %v554_v7 = vand.u32 2147483648, %v1791_v24 }
 0x207   :  { %v369_v28 = vpop.f32.mrf.mxu1  ;;  %vm553_vm13 = vcmp.eq.f32.partialorder %v552_v6, 8.507059e+37 }
 0x208   :  { %v370_v32 = vadd.f32 %v1758_v54, %v369_v28  ;;  %v531_v33 = vmul.f32 %v1444_v23, %v530_v27  ;;  %v555_v19 = vor.u32 1.1754944e-38, %v554_v7 }
 0x20a   :  { %v1446_v36 = vpop.eup %1445  ;;  %v1320_v37 = vmul.f32 -1.442695, %v370_v32  ;;  %v532_v39 = vadd.f32 %v1444_v23, %v531_v33 }
 0x20b   :  { %v1448_v47 = vpop.eup %1447  ;;  %v444_v48 = vadd.f32 1.0, %v1446_v36 }
 0x20c   :  { %1449 = vpow2.f32 %v1320_v37  ;;  %v536_v52 = vsel %vm535_vm6, %v1444_v23, %v532_v39  ;;  %v544_v53 = vmul.f32 %v1448_v47, %v1791_v24  ;;  %vm549_vm8 = vweird.f32 %v1448_v47 }
 0x20d   :  { %1451 = vrcp.f32 %v444_v48  ;;  %v541_v56 = vsel %vm538_vm7, %v540_v51, %v536_v52  ;;  %v569_v8 = vand.u32 2147483648, %v444_v48  ;;  %v567_v11 = vand.u32 2147483647, %v444_v48  ;;  %vm1813_vm11 = vmor %vm548_vm9, %vm549_vm8 }
 0x20e   :  { %v695_v57 = vpack.c.bf16 %v541_v56, %v526_v55  ;;  %v545_v58 = vsub.f32 1.0, %v544_v53  ;;  %vm563_vm12 = vweird.f32 %v444_v48 }
 0x20f   :  { %v371_v59 = vpop.f32.mrf.mxu1  ;;  %v570_v20 = vor.u32 1.1754944e-38, %v569_v8  ;;  %vm568_vm15 = vcmp.eq.f32.partialorder %v567_v11, 8.507059e+37 }
 0x210   :  { %v372_v60 = vadd.f32 %v1758_v54, %v371_v59  ;;  %783 = vmatmul.bf16.gmra.mxu2 %v695_v57  ;;  %v546_v63 = vmul.f32 %v1448_v47, %v545_v58 }
 0x212   :  { %v1450_v61 = vpop.eup %1449  ;;  %v1321_v62 = vmul.f32 -1.442695, %v372_v60  ;;  %v547_v3 = vadd.f32 %v1448_v47, %v546_v63 }
 0x213   :  { %v1452_v0 = vpop.eup %1451  ;;  %v1806_v1 = vadd.f32 1.0, %v1450_v61 }
 0x214   :  { %1453 = vpow2.f32 %v1321_v62  ;;  %v559_v2 = vmul.f32 %v1452_v0, %v444_v48  ;;  %vm564_vm10 = vweird.f32 %v1452_v0  ;;  %v551_v15 = vsel %vm1813_vm11, %v1448_v47, %v547_v3 }
 0x215   :  { %1455 = vrcp.f32 %v1806_v1  ;;  %vm565_vm14 = vmor %vm563_vm12, %vm564_vm10  ;;  %v556_v23 = vsel %vm553_vm13, %v555_v19, %v551_v15  ;;  %vm578_vm1 = vweird.f32 %v1806_v1  ;;  %v582_v38 = vand.u32 2147483647, %v1806_v1 }
 0x216   :  { %v560_v4 = vsub.f32 1.0, %v559_v2  ;;  %v584_v39 = vand.u32 2147483648, %v1806_v1 }
 0x217   :  { %v374_v5 = vpop.f32.mrf.mxu1  ;;  %vm583_vm5 = vcmp.eq.f32.partialorder %v582_v38, 8.507059e+37 }
 0x218   :  { %v375_v9 = vadd.f32 %v1758_v54, %v374_v5  ;;  %v561_v10 = vmul.f32 %v1452_v0, %v560_v4  ;;  %v585_v60 = vor.u32 1.1754944e-38, %v584_v39 }
 0x21a   :  { %v1454_v13 = vpop.eup %1453  ;;  %v1322_v14 = vmul.f32 -1.442695, %v375_v9  ;;  %v562_v16 = vadd.f32 %v1452_v0, %v561_v10 }
 0x21b   :  { %v1456_v17 = vpop.eup %1455  ;;  %v446_v18 = vadd.f32 1.0, %v1454_v13 }
 0x21c   :  { %1457 = vpow2.f32 %v1322_v14  ;;  %v566_v21 = vsel %vm565_vm14, %v1452_v0, %v562_v16  ;;  %v574_v22 = vmul.f32 %v1456_v17, %v1806_v1  ;;  %vm579_vm0 = vweird.f32 %v1456_v17 }
 0x21d   :  { %1459 = vrcp.f32 %v446_v18  ;;  %v571_v24 = vsel %vm568_vm15, %v570_v20, %v566_v21  ;;  %v599_v47 = vand.u32 2147483648, %v446_v18  ;;  %v597_v51 = vand.u32 2147483647, %v446_v18  ;;  %vm1828_vm3 = vmor %vm578_vm1, %vm579_vm0 }
 0x21e   :  { %v696_v25 = vpack.c.bf16 %v571_v24, %v556_v23  ;;  %v575_v26 = vsub.f32 1.0, %v574_v22  ;;  %vm593_vm4 = vweird.f32 %v446_v18 }
 0x21f   :  { %v376_v27 = vpop.f32.mrf.mxu1  ;;  %v600_v61 = vor.u32 1.1754944e-38, %v599_v47  ;;  %vm598_vm7 = vcmp.eq.f32.partialorder %v597_v51, 8.507059e+37 }
 0x220   :  { %v377_v28 = vadd.f32 %v1758_v54, %v376_v27  ;;  %788 = vmatmul.bf16.gmra.mxu2 %v696_v25  ;;  %v576_v31 = vmul.f32 %v1456_v17, %v575_v26 }
 0x222   :  { %v1458_v29 = vpop.eup %1457  ;;  %v1323_v30 = vmul.f32 -1.442695, %v377_v28  ;;  %v577_v35 = vadd.f32 %v1456_v17, %v576_v31 }
 0x223   :  { %v1460_v32 = vpop.eup %1459  ;;  %v1821_v33 = vadd.f32 1.0, %v1458_v29 }
 0x224   :  { %1461 = vpow2.f32 %v1323_v30  ;;  %v589_v34 = vmul.f32 %v1460_v32, %v446_v18  ;;  %vm594_vm2 = vweird.f32 %v1460_v32  ;;  %v581_v56 = vsel %vm1828_vm3, %v1456_v17, %v577_v35 }
 0x225   :  { %1463 = vrcp.f32 %v1821_v33  ;;  %vm595_vm6 = vmor %vm593_vm4, %vm594_vm2  ;;  %v586_v0 = vsel %vm583_vm5, %v585_v60, %v581_v56  ;;  %vm608_vm9 = vweird.f32 %v1821_v33  ;;  %v612_v15 = vand.u32 2147483647, %v1821_v33 }
 0x226   :  { %v590_v36 = vsub.f32 1.0, %v589_v34  ;;  %v614_v16 = vand.u32 2147483648, %v1821_v33 }
 0x227   :  { %v379_v37 = vpop.f32.mrf.mxu1  ;;  %vm613_vm13 = vcmp.eq.f32.partialorder %v612_v15, 8.507059e+37 }
 0x228   :  { %v380_v48 = vadd.f32 %v1758_v54, %v379_v37  ;;  %v591_v50 = vmul.f32 %v1460_v32, %v590_v36  ;;  %v615_v28 = vor.u32 1.1754944e-38, %v614_v16 }
 0x22a   :  { %v1462_v53 = vpop.eup %1461  ;;  %v1324_v55 = vmul.f32 -1.442695, %v380_v48  ;;  %v592_v57 = vadd.f32 %v1460_v32, %v591_v50 }
 0x22b   :  { %v1464_v58 = vpop.eup %1463  ;;  %v448_v59 = vadd.f32 1.0, %v1462_v53 }
 0x22c   :  { %1465 = vpow2.f32 %v1324_v55  ;;  %v596_v62 = vsel %vm595_vm6, %v1460_v32, %v592_v57  ;;  %v604_v63 = vmul.f32 %v1464_v58, %v1821_v33  ;;  %vm609_vm8 = vweird.f32 %v1464_v58 }
 0x22d   :  { %1467 = vrcp.f32 %v448_v59  ;;  %v601_v1 = vsel %vm598_vm7, %v600_v61, %v596_v62  ;;  %v629_v17 = vand.u32 2147483648, %v448_v59  ;;  %v627_v20 = vand.u32 2147483647, %v448_v59  ;;  %vm1843_vm11 = vmor %vm608_vm9, %vm609_vm8 }
 0x22e   :  { %v697_v2 = vpack.c.bf16 %v601_v1, %v586_v0  ;;  %v605_v3 = vsub.f32 1.0, %v604_v63  ;;  %vm623_vm12 = vweird.f32 %v448_v59 }
 0x22f   :  { %v381_v4 = vpop.f32.mrf.mxu1  ;;  %v630_v29 = vor.u32 1.1754944e-38, %v629_v17  ;;  %vm628_vm15 = vcmp.eq.f32.partialorder %v627_v20, 8.507059e+37 }
 0x230   :  { %v382_v5 = vadd.f32 %v1758_v54, %v381_v4  ;;  %793 = vmatmul.bf16.gmra.mxu2 %v697_v2  ;;  %v606_v8 = vmul.f32 %v1464_v58, %v605_v3 }
 0x232   :  { %v1466_v6 = vpop.eup %1465  ;;  %v1325_v7 = vmul.f32 -1.442695, %v382_v5  ;;  %v607_v12 = vadd.f32 %v1464_v58, %v606_v8 }
 0x233   :  { %v1468_v9 = vpop.eup %1467  ;;  %v1836_v10 = vadd.f32 1.0, %v1466_v6 }
 0x234   :  { %1469 = vpow2.f32 %v1325_v7  ;;  %v619_v11 = vmul.f32 %v1468_v9, %v448_v59  ;;  %vm624_vm10 = vweird.f32 %v1468_v9  ;;  %v611_v24 = vsel %vm1843_vm11, %v1464_v58, %v607_v12  ;;  %v1871_v59 = vld [vmem:[%s1897_s5] ss:$0 sm:$0xff]  ;;  %s1681_s5 = smov [#allocation10]  }
 0x235   :  { %1471 = vrcp.f32 %v1836_v10  ;;  %vm625_vm14 = vmor %vm623_vm12, %vm624_vm10  ;;  %v616_v32 = vsel %vm613_vm13, %v615_v28, %v611_v24  ;;  %vm638_vm1 = vweird.f32 %v1836_v10  ;;  %v644_v55 = vand.u32 2147483648, %v1836_v10  ;;  %s1199_s18 = sshll.u32 %s1681_s5, 4  ;;  %s1200_s18 = int_to_ptr.vmem [resolvable:$true] %s1199_s18 }
 0x236   :  { %v620_v13 = vsub.f32 1.0, %v619_v11  ;;  %v642_v57 = vand.u32 2147483647, %v1836_v10 }
 0x237   :  { %v384_v14 = vpop.f32.mrf.mxu1  ;;  %v645_v1 = vor.u32 1.1754944e-38, %v644_v55 }
 0x238   :  { %v385_v18 = vadd.f32 %v1758_v54, %v384_v14  ;;  %v621_v19 = vmul.f32 %v1468_v9, %v620_v13  ;;  %vm643_vm6 = vcmp.eq.f32.partialorder %v642_v57, 8.507059e+37 }
 0x23a   :  { %v1470_v22 = vpop.eup %1469  ;;  %v1326_v23 = vmul.f32 -1.442695, %v385_v18  ;;  %v622_v25 = vadd.f32 %v1468_v9, %v621_v19 }
 0x23b   :  { %v1472_v26 = vpop.eup %1471  ;;  %v450_v27 = vadd.f32 1.0, %v1470_v22 }
 0x23c   :  { %1473 = vpow2.f32 %v1326_v23  ;;  %v626_v30 = vsel %vm625_vm14, %v1468_v9, %v622_v25  ;;  %v634_v31 = vmul.f32 %v1472_v26, %v1836_v10  ;;  %vm639_vm0 = vweird.f32 %v1472_v26 }
 0x23d   :  { %1475 = vrcp.f32 %v450_v27  ;;  %v631_v33 = vsel %vm628_vm15, %v630_v29, %v626_v30  ;;  %v659_v56 = vand.u32 2147483648, %v450_v27  ;;  %v657_v58 = vand.u32 2147483647, %v450_v27  ;;  %vm1854_vm3 = vmor %vm638_vm1, %vm639_vm0 }
 0x23e   :  { %v698_v34 = vpack.c.bf16 %v631_v33, %v616_v32  ;;  %v635_v35 = vsub.f32 1.0, %v634_v31  ;;  %vm653_vm4 = vweird.f32 %v450_v27 }
 0x23f   :  { %v386_v36 = vpop.f32.mrf.mxu1  ;;  %v660_v2 = vor.u32 1.1754944e-38, %v659_v56  ;;  %vm658_vm7 = vcmp.eq.f32.partialorder %v657_v58, 8.507059e+37 }
 0x240   :  { %v387_v37 = vadd.f32 %v1758_v54, %v386_v36  ;;  %798 = vmatmul.bf16.gmra.mxu2 %v698_v34  ;;  %v636_v47 = vmul.f32 %v1472_v26, %v635_v35 }
 0x242   :  { %v1474_v38 = vpop.eup %1473  ;;  %v1327_v39 = vmul.f32 -1.442695, %v387_v37  ;;  %v637_v52 = vadd.f32 %v1472_v26, %v636_v47 }
 0x243   :  { %v1476_v48 = vpop.eup %1475  ;;  %v451_v50 = vadd.f32 1.0, %v1474_v38 }
 0x244   :  { %1477 = vpow2.f32 %v1327_v39  ;;  %v649_v51 = vmul.f32 %v1476_v48, %v450_v27  ;;  %vm654_vm2 = vweird.f32 %v1476_v48  ;;  %v641_v61 = vsel %vm1854_vm3, %v1472_v26, %v637_v52 }
 0x245   :  { %1479 = vrcp.f32 %v451_v50  ;;  %vm655_vm5 = vmor %vm653_vm4, %vm654_vm2  ;;  %v646_v5 = vsel %vm643_vm6, %v645_v1, %v641_v61  ;;  %vm668_vm9 = vweird.f32 %v451_v50  ;;  %v674_v14 = vand.u32 2147483648, %v451_v50 }
 0x246   :  { %v650_v53 = vsub.f32 1.0, %v649_v51  ;;  %v672_v16 = vand.u32 2147483647, %v451_v50 }
 0x247   :  { %v675_v21 = vor.u32 1.1754944e-38, %v674_v14 }
 0x248   :  { %v651_v54 = vmul.f32 %v1476_v48, %v650_v53  ;;  %vm673_vm14 = vcmp.eq.f32.partialorder %v672_v16, 8.507059e+37 }
 0x24a   :  { %v1478_v60 = vpop.eup %1477  ;;  %v652_v62 = vadd.f32 %v1476_v48, %v651_v54 }
 0x24b   :  { %v1480_v63 = vpop.eup %1479  ;;  %v452_v0 = vadd.f32 1.0, %v1478_v60 }
 0x24c   :  { %v656_v3 = vsel %vm655_vm5, %v1476_v48, %v652_v62  ;;  %v664_v4 = vmul.f32 %v1480_v63, %v451_v50  ;;  %vm669_vm8 = vweird.f32 %v1480_v63 }
 0x24d   :  { %1481 = vrcp.f32 %v452_v0  ;;  %v661_v6 = vsel %vm658_vm7, %v660_v2, %v656_v3  ;;  %v689_v15 = vand.u32 2147483648, %v452_v0  ;;  %v687_v18 = vand.u32 2147483647, %v452_v0  ;;  %vm670_vm11 = vmor %vm668_vm9, %vm669_vm8 }
 0x24e   :  { %v699_v7 = vpack.c.bf16 %v661_v6, %v646_v5  ;;  %v665_v8 = vsub.f32 1.0, %v664_v4  ;;  %vm683_vm12 = vweird.f32 %v452_v0 }
 0x24f   :  { %v690_v22 = vor.u32 1.1754944e-38, %v689_v15  ;;  %vm688_vm15 = vcmp.eq.f32.partialorder %v687_v18, 8.507059e+37 }
 0x250   :  { %803 = vmatmul.bf16.gmra.mxu2 %v699_v7  ;;  %v666_v9 = vmul.f32 %v1480_v63, %v665_v8 }
 0x252   :  { %v667_v12 = vadd.f32 %v1480_v63, %v666_v9 }
 0x253   :  { %v1482_v10 = vpop.eup %1481 }
 0x254   :  { %v679_v11 = vmul.f32 %v1482_v10, %v452_v0  ;;  %vm684_vm10 = vweird.f32 %v1482_v10  ;;  %v671_v19 = vsel %vm670_vm11, %v1480_v63, %v667_v12 }
 0x255   :  { %vm685_vm13 = vmor %vm683_vm12, %vm684_vm10  ;;  %v676_v24 = vsel %vm673_vm14, %v675_v21, %v671_v19 }
 0x256   :  { %v680_v13 = vsub.f32 1.0, %v679_v11 }
 0x258   :  { %v681_v17 = vmul.f32 %v1482_v10, %v680_v13 }
 0x25a   :  { %v682_v20 = vadd.f32 %v1482_v10, %v681_v17 }
 0x25c   :  { %v686_v23 = vsel %vm685_vm13, %v1482_v10, %v682_v20 }
 0x25d   :  { %v691_v25 = vsel %vm688_vm15, %v690_v22, %v686_v23 }
 0x25e   :  { %v700_v26 = vpack.c.bf16 %v691_v25, %v676_v24 }
 0x260   :  { %808 = vmatmul.bf16.gmra.mxu2 %v700_v26 }
 0x273   :  { %v774_v27 = vpop.f32.mrf.mxu2 }
 0x27b   :  { %v776_v28 = vpop.f32.mrf.mxu2 }
 0x27c   :  { %v814_v29 = vpack.c.bf16 %v776_v28, %v774_v27 }
 0x283   :  { %v779_v30 = vpop.f32.mrf.mxu2 }
 0x28b   :  { %v781_v31 = vpop.f32.mrf.mxu2 }
 0x28c   :  { %v815_v32 = vpack.c.bf16 %v781_v31, %v779_v30 }
 0x293   :  { %v784_v33 = vpop.f32.mrf.mxu2 }
 0x29b   :  { %v786_v34 = vpop.f32.mrf.mxu2 }
 0x29c   :  { %v816_v35 = vpack.c.bf16 %v786_v34, %v784_v33 }
 0x2a3   :  { %v789_v36 = vpop.f32.mrf.mxu2 }
 0x2ab   :  { %v791_v37 = vpop.f32.mrf.mxu2 }
 0x2ac   :  { %v817_v38 = vpack.c.bf16 %v791_v37, %v789_v36 }
 0x2b3   :  { %v794_v39 = vpop.f32.mrf.mxu2 }
 0x2bb   :  { %v796_v47 = vpop.f32.mrf.mxu2 }
 0x2bc   :  { %v818_v58 = vpack.c.bf16 %v796_v47, %v794_v39 }
 0x2c3   :  { %v799_v48 = vpop.f32.mrf.mxu2 }
 0x2cb   :  { %v801_v50 = vpop.f32.mrf.mxu2 }
 0x2cc   :  { %v819_v54 = vpack.c.bf16 %v801_v50, %v799_v48 }
 0x2d3   :  { %v804_v51 = vpop.f32.mrf.mxu2 }
 0x2db   :  { %v806_v52 = vpop.f32.mrf.mxu2 }
 0x2dc   :  { %v820_v57 = vpack.c.bf16 %v806_v52, %v804_v51 }
 0x2e3   :  { %v809_v53 = vpop.f32.mrf.mxu2 }
 0x2eb   :  { %v811_v55 = vpop.f32.mrf.mxu2 }
 0x2ec   :  { %v821_v56 = vpack.c.bf16 %v811_v55, %v809_v53 }
 0x2ee   :  { %826 = vmatpush.bf16.msra.mxu3 %v821_v56 }
 0x2f2   :  { %827 = vmatpush.bf16.msra.mxu3 %v820_v57 }
 0x2f6   :  { %828 = vmatpush.bf16.msra.mxu3 %v819_v54 }
 0x2fa   :  { %829 = vmatpush.bf16.msra.mxu3 %v818_v58 }
 0x2fe   :  { %830 = vmatpush.bf16.msra.mxu3 %v817_v38 }
 0x302   :  { %831 = vmatpush.bf16.msra.mxu3 %v816_v35 }
 0x306   :  { %832 = vmatpush.bf16.msra.mxu3 %v815_v32 }
 0x30a   :  { %833 = vmatpush.bf16.msra.mxu3 %v814_v29 }
 0x30d   :  { %834 = vmatmul.bf16.vlgmr.msra.gmra.mxu3 %v1731_v40 }
 0x31d   :  { %839 = vmatmul.bf16.gmra.mxu3 %v1734_v41 }
 0x32d   :  { %844 = vmatmul.bf16.gmra.mxu3 %v1737_v42 }
 0x33d   :  { %849 = vmatmul.bf16.gmra.mxu3 %v1740_v43 }
 0x34d   :  { %854 = vmatmul.bf16.gmra.mxu3 %v1743_v44 }
 0x35d   :  { %859 = vmatmul.bf16.gmra.mxu3 %v1746_v45 }
 0x36d   :  { %864 = vmatmul.bf16.gmra.mxu3 %v1749_v46 }
 0x37d   :  { %869 = vmatmul.bf16.gmra.mxu3 %v1752_v49 }
 0x390   :  { %v835_v40 = vpop.f32.mrf.mxu3 }
 0x391   :  { %v836_v41 = vadd.f32 %v1871_v59, %v835_v40 }
 0x393   :  { %v1360_v60 = vmul.f32 -1.442695, %v836_v41 }
 0x395   :  { %1483 = vpow2.f32 %v1360_v60 }
 0x398   :  { %v837_v42 = vpop.f32.mrf.mxu3 }
 0x399   :  { %v838_v43 = vadd.f32 %v1871_v59, %v837_v42 }
 0x39b   :  { %v1484_v44 = vpop.eup %1483  ;;  %v1361_v61 = vmul.f32 -1.442695, %v838_v43 }
 0x39c   :  { %v923_v45 = vadd.f32 1.0, %v1484_v44 }
 0x39d   :  { %1485 = vpow2.f32 %v1361_v61 }
 0x39e   :  { %1487 = vrcp.f32 %v923_v45  ;;  %v950_v4 = vand.u32 2147483648, %v923_v45  ;;  %v948_v7 = vand.u32 2147483647, %v923_v45  ;;  %vm944_vm1 = vweird.f32 %v923_v45 }
 0x3a0   :  { %v840_v46 = vpop.f32.mrf.mxu3  ;;  %v951_v13 = vor.u32 1.1754944e-38, %v950_v4  ;;  %vm949_vm3 = vcmp.eq.f32.partialorder %v948_v7, 8.507059e+37 }
 0x3a1   :  { %v841_v49 = vadd.f32 %v1871_v59, %v840_v46 }
 0x3a3   :  { %v1486_v62 = vpop.eup %1485  ;;  %v1362_v63 = vmul.f32 -1.442695, %v841_v49 }
 0x3a4   :  { %v1488_v0 = vpop.eup %1487  ;;  %v924_v1 = vadd.f32 1.0, %v1486_v62 }
 0x3a5   :  { %v940_v2 = vmul.f32 %v1488_v0, %v923_v45  ;;  %1489 = vpow2.f32 %v1362_v63  ;;  %vm945_vm0 = vweird.f32 %v1488_v0 }
 0x3a6   :  { %1491 = vrcp.f32 %v924_v1  ;;  %vm946_vm2 = vmor %vm944_vm1, %vm945_vm0  ;;  %v965_v19 = vand.u32 2147483648, %v924_v1  ;;  %v963_v22 = vand.u32 2147483647, %v924_v1  ;;  %vm959_vm5 = vweird.f32 %v924_v1 }
 0x3a7   :  { %v941_v3 = vsub.f32 1.0, %v940_v2 }
 0x3a8   :  { %v842_v5 = vpop.f32.mrf.mxu3  ;;  %v966_v28 = vor.u32 1.1754944e-38, %v965_v19  ;;  %vm964_vm7 = vcmp.eq.f32.partialorder %v963_v22, 8.507059e+37 }
 0x3a9   :  { %v942_v6 = vmul.f32 %v1488_v0, %v941_v3  ;;  %v843_v8 = vadd.f32 %v1871_v59, %v842_v5 }
 0x3ab   :  { %v1490_v9 = vpop.eup %1489  ;;  %v943_v10 = vadd.f32 %v1488_v0, %v942_v6  ;;  %v1363_v11 = vmul.f32 -1.442695, %v843_v8 }
 0x3ac   :  { %v1492_v12 = vpop.eup %1491  ;;  %v925_v14 = vadd.f32 1.0, %v1490_v9 }
 0x3ad   :  { %v947_v15 = vsel %vm946_vm2, %v1488_v0, %v943_v10  ;;  %v955_v16 = vmul.f32 %v1492_v12, %v924_v1  ;;  %1493 = vpow2.f32 %v1363_v11  ;;  %vm960_vm4 = vweird.f32 %v1492_v12 }
 0x3ae   :  { %v952_v17 = vsel %vm949_vm3, %v951_v13, %v947_v15  ;;  %1495 = vrcp.f32 %v925_v14  ;;  %vm961_vm6 = vmor %vm959_vm5, %vm960_vm4  ;;  %v980_v34 = vand.u32 2147483648, %v925_v14  ;;  %v978_v37 = vand.u32 2147483647, %v925_v14 }
 0x3af   :  { %1179 = vst [vmem:[#allocation10] sm:$0xff] %v952_v17  ;;  %v956_v18 = vsub.f32 1.0, %v955_v16  ;;  %vm974_vm9 = vweird.f32 %v925_v14 }
 0x3b0   :  { %v845_v20 = vpop.f32.mrf.mxu3  ;;  %v981_v51 = vor.u32 1.1754944e-38, %v980_v34  ;;  %vm979_vm11 = vcmp.eq.f32.partialorder %v978_v37, 8.507059e+37 }
 0x3b1   :  { %v957_v21 = vmul.f32 %v1492_v12, %v956_v18  ;;  %v846_v23 = vadd.f32 %v1871_v59, %v845_v20 }
 0x3b3   :  { %v1494_v24 = vpop.eup %1493  ;;  %v958_v25 = vadd.f32 %v1492_v12, %v957_v21  ;;  %v1364_v26 = vmul.f32 -1.442695, %v846_v23 }
 0x3b4   :  { %v1496_v27 = vpop.eup %1495  ;;  %v926_v29 = vadd.f32 1.0, %v1494_v24 }
 0x3b5   :  { %v962_v30 = vsel %vm961_vm6, %v1492_v12, %v958_v25  ;;  %v970_v31 = vmul.f32 %v1496_v27, %v925_v14  ;;  %1497 = vpow2.f32 %v1364_v26  ;;  %vm975_vm8 = vweird.f32 %v1496_v27 }
 0x3b6   :  { %v967_v32 = vsel %vm964_vm7, %v966_v28, %v962_v30  ;;  %1499 = vrcp.f32 %v926_v29  ;;  %vm976_vm10 = vmor %vm974_vm9, %vm975_vm8  ;;  %v995_v54 = vand.u32 2147483648, %v926_v29  ;;  %v993_v41 = vand.u32 2147483647, %v926_v29 }
 0x3b7   :  { %1180 = vst [vmem:[#allocation10 + $0x8] sm:$0xff] %v967_v32  ;;  %v971_v33 = vsub.f32 1.0, %v970_v31  ;;  %vm989_vm13 = vweird.f32 %v926_v29 }
 0x3b8   :  { %v847_v35 = vpop.f32.mrf.mxu3  ;;  %v996_v45 = vor.u32 1.1754944e-38, %v995_v54  ;;  %vm994_vm15 = vcmp.eq.f32.partialorder %v993_v41, 8.507059e+37 }
 0x3b9   :  { %v972_v36 = vmul.f32 %v1496_v27, %v971_v33  ;;  %v848_v38 = vadd.f32 %v1871_v59, %v847_v35 }
 0x3bb   :  { %v1498_v39 = vpop.eup %1497  ;;  %v973_v47 = vadd.f32 %v1496_v27, %v972_v36  ;;  %v1365_v48 = vmul.f32 -1.442695, %v848_v38 }
 0x3bc   :  { %v1500_v50 = vpop.eup %1499  ;;  %v927_v52 = vadd.f32 1.0, %v1498_v39 }
 0x3bd   :  { %v977_v53 = vsel %vm976_vm10, %v1496_v27, %v973_v47  ;;  %v985_v55 = vmul.f32 %v1500_v50, %v926_v29  ;;  %1501 = vpow2.f32 %v1365_v48  ;;  %vm990_vm12 = vweird.f32 %v1500_v50 }
 0x3be   :  { %v982_v56 = vsel %vm979_vm11, %v981_v51, %v977_v53  ;;  %1503 = vrcp.f32 %v927_v52  ;;  %vm991_vm14 = vmor %vm989_vm13, %vm990_vm12  ;;  %v1010_v1 = vand.u32 2147483648, %v927_v52  ;;  %v1008_v4 = vand.u32 2147483647, %v927_v52 }
 0x3bf   :  { %1181 = vst [vmem:[#allocation10 + $0x10] sm:$0xff] %v982_v56  ;;  %v986_v57 = vsub.f32 1.0, %v985_v55  ;;  %vm1004_vm1 = vweird.f32 %v927_v52 }
 0x3c0   :  { %v850_v58 = vpop.f32.mrf.mxu3  ;;  %v1011_v10 = vor.u32 1.1754944e-38, %v1010_v1  ;;  %vm1009_vm3 = vcmp.eq.f32.partialorder %v1008_v4, 8.507059e+37 }
 0x3c1   :  { %v987_v40 = vmul.f32 %v1500_v50, %v986_v57  ;;  %v851_v60 = vadd.f32 %v1871_v59, %v850_v58 }
 0x3c3   :  { %v1502_v42 = vpop.eup %1501  ;;  %v988_v43 = vadd.f32 %v1500_v50, %v987_v40  ;;  %v1366_v44 = vmul.f32 -1.442695, %v851_v60 }
 0x3c4   :  { %v1504_v61 = vpop.eup %1503  ;;  %v928_v46 = vadd.f32 1.0, %v1502_v42 }
 0x3c5   :  { %v992_v49 = vsel %vm991_vm14, %v1500_v50, %v988_v43  ;;  %v1000_v62 = vmul.f32 %v1504_v61, %v927_v52  ;;  %1505 = vpow2.f32 %v1366_v44  ;;  %vm1005_vm0 = vweird.f32 %v1504_v61 }
 0x3c6   :  { %v997_v63 = vsel %vm994_vm15, %v996_v45, %v992_v49  ;;  %1507 = vrcp.f32 %v928_v46  ;;  %vm1006_vm2 = vmor %vm1004_vm1, %vm1005_vm0  ;;  %v1025_v16 = vand.u32 2147483648, %v928_v46  ;;  %v1023_v19 = vand.u32 2147483647, %v928_v46 }
 0x3c7   :  { %1182 = vst [vmem:[#allocation10 + $0x18] sm:$0xff] %v997_v63  ;;  %v1001_v0 = vsub.f32 1.0, %v1000_v62  ;;  %vm1019_vm5 = vweird.f32 %v928_v46 }
 0x3c8   :  { %v852_v2 = vpop.f32.mrf.mxu3  ;;  %v1026_v25 = vor.u32 1.1754944e-38, %v1025_v16  ;;  %vm1024_vm7 = vcmp.eq.f32.partialorder %v1023_v19, 8.507059e+37 }
 0x3c9   :  { %v1002_v3 = vmul.f32 %v1504_v61, %v1001_v0  ;;  %v853_v5 = vadd.f32 %v1871_v59, %v852_v2 }
 0x3cb   :  { %v1506_v6 = vpop.eup %1505  ;;  %v1003_v7 = vadd.f32 %v1504_v61, %v1002_v3  ;;  %v1367_v8 = vmul.f32 -1.442695, %v853_v5 }
 0x3cc   :  { %v1508_v9 = vpop.eup %1507  ;;  %v929_v11 = vadd.f32 1.0, %v1506_v6 }
 0x3cd   :  { %v1007_v12 = vsel %vm1006_vm2, %v1504_v61, %v1003_v7  ;;  %v1015_v13 = vmul.f32 %v1508_v9, %v928_v46  ;;  %1509 = vpow2.f32 %v1367_v8  ;;  %vm1020_vm4 = vweird.f32 %v1508_v9 }
 0x3ce   :  { %v1012_v14 = vsel %vm1009_vm3, %v1011_v10, %v1007_v12  ;;  %1511 = vrcp.f32 %v929_v11  ;;  %vm1021_vm6 = vmor %vm1019_vm5, %vm1020_vm4  ;;  %v1040_v31 = vand.u32 2147483648, %v929_v11  ;;  %v1038_v34 = vand.u32 2147483647, %v929_v11 }
 0x3cf   :  { %1183 = vst [vmem:[#allocation10 + $0x20] sm:$0xff] %v1012_v14  ;;  %v1016_v15 = vsub.f32 1.0, %v1015_v13  ;;  %vm1034_vm9 = vweird.f32 %v929_v11 }
 0x3d0   :  { %v855_v17 = vpop.f32.mrf.mxu3  ;;  %v1041_v47 = vor.u32 1.1754944e-38, %v1040_v31  ;;  %vm1039_vm11 = vcmp.eq.f32.partialorder %v1038_v34, 8.507059e+37 }
 0x3d1   :  { %v1017_v18 = vmul.f32 %v1508_v9, %v1016_v15  ;;  %v856_v20 = vadd.f32 %v1871_v59, %v855_v17 }
 0x3d3   :  { %v1510_v21 = vpop.eup %1509  ;;  %v1018_v22 = vadd.f32 %v1508_v9, %v1017_v18  ;;  %v1368_v23 = vmul.f32 -1.442695, %v856_v20 }
 0x3d4   :  { %v1512_v24 = vpop.eup %1511  ;;  %v930_v26 = vadd.f32 1.0, %v1510_v21 }
 0x3d5   :  { %v1022_v27 = vsel %vm1021_vm6, %v1508_v9, %v1018_v22  ;;  %v1030_v28 = vmul.f32 %v1512_v24, %v929_v11  ;;  %1513 = vpow2.f32 %v1368_v23  ;;  %vm1035_vm8 = vweird.f32 %v1512_v24 }
 0x3d6   :  { %v1027_v29 = vsel %vm1024_vm7, %v1026_v25, %v1022_v27  ;;  %1515 = vrcp.f32 %v930_v26  ;;  %vm1036_vm10 = vmor %vm1034_vm9, %vm1035_vm8  ;;  %v1055_v55 = vand.u32 2147483648, %v930_v26  ;;  %v1053_v54 = vand.u32 2147483647, %v930_v26 }
 0x3d7   :  { %1184 = vst [vmem:[#allocation10 + $0x28] sm:$0xff] %v1027_v29  ;;  %v1031_v30 = vsub.f32 1.0, %v1030_v28  ;;  %vm1049_vm13 = vweird.f32 %v930_v26 }
 0x3d8   :  { %v857_v32 = vpop.f32.mrf.mxu3  ;;  %v1056_v43 = vor.u32 1.1754944e-38, %v1055_v55  ;;  %vm1054_vm15 = vcmp.eq.f32.partialorder %v1053_v54, 8.507059e+37 }
 0x3d9   :  { %v1032_v33 = vmul.f32 %v1512_v24, %v1031_v30  ;;  %v858_v35 = vadd.f32 %v1871_v59, %v857_v32 }
 0x3db   :  { %v1514_v36 = vpop.eup %1513  ;;  %v1033_v37 = vadd.f32 %v1512_v24, %v1032_v33  ;;  %v1369_v38 = vmul.f32 -1.442695, %v858_v35 }
 0x3dc   :  { %v1516_v39 = vpop.eup %1515  ;;  %v931_v48 = vadd.f32 1.0, %v1514_v36 }
 0x3dd   :  { %v1037_v50 = vsel %vm1036_vm10, %v1512_v24, %v1033_v37  ;;  %v1045_v51 = vmul.f32 %v1516_v39, %v930_v26  ;;  %1517 = vpow2.f32 %v1369_v38  ;;  %vm1050_vm12 = vweird.f32 %v1516_v39 }
 0x3de   :  { %v1042_v52 = vsel %vm1039_vm11, %v1041_v47, %v1037_v50  ;;  %1519 = vrcp.f32 %v931_v48  ;;  %vm1051_vm14 = vmor %vm1049_vm13, %vm1050_vm12  ;;  %v1070_v62 = vand.u32 2147483648, %v931_v48  ;;  %v1068_v1 = vand.u32 2147483647, %v931_v48 }
 0x3df   :  { %1185 = vst [vmem:[#allocation10 + $0x30] sm:$0xff] %v1042_v52  ;;  %v1046_v53 = vsub.f32 1.0, %v1045_v51  ;;  %vm1064_vm1 = vweird.f32 %v931_v48 }
 0x3e0   :  { %v860_v56 = vpop.f32.mrf.mxu3  ;;  %v1071_v7 = vor.u32 1.1754944e-38, %v1070_v62  ;;  %vm1069_vm3 = vcmp.eq.f32.partialorder %v1068_v1, 8.507059e+37 }
 0x3e1   :  { %v1047_v57 = vmul.f32 %v1516_v39, %v1046_v53  ;;  %v861_v58 = vadd.f32 %v1871_v59, %v860_v56 }
 0x3e3   :  { %v1518_v40 = vpop.eup %1517  ;;  %v1048_v41 = vadd.f32 %v1516_v39, %v1047_v57  ;;  %v1370_v60 = vmul.f32 -1.442695, %v861_v58 }
 0x3e4   :  { %v1520_v42 = vpop.eup %1519  ;;  %v932_v44 = vadd.f32 1.0, %v1518_v40 }
 0x3e5   :  { %v1052_v61 = vsel %vm1051_vm14, %v1516_v39, %v1048_v41  ;;  %v1060_v45 = vmul.f32 %v1520_v42, %v931_v48  ;;  %1521 = vpow2.f32 %v1370_v60  ;;  %vm1065_vm0 = vweird.f32 %v1520_v42 }
 0x3e6   :  { %v1057_v46 = vsel %vm1054_vm15, %v1056_v43, %v1052_v61  ;;  %1523 = vrcp.f32 %v932_v44  ;;  %vm1066_vm2 = vmor %vm1064_vm1, %vm1065_vm0  ;;  %v1085_v13 = vand.u32 2147483648, %v932_v44  ;;  %v1083_v16 = vand.u32 2147483647, %v932_v44 }
 0x3e7   :  { %1186 = vst [vmem:[#allocation10 + $0x38] sm:$0xff] %v1057_v46  ;;  %v1061_v49 = vsub.f32 1.0, %v1060_v45  ;;  %vm1079_vm5 = vweird.f32 %v932_v44 }
 0x3e8   :  { %v862_v63 = vpop.f32.mrf.mxu3  ;;  %v1086_v22 = vor.u32 1.1754944e-38, %v1085_v13  ;;  %vm1084_vm7 = vcmp.eq.f32.partialorder %v1083_v16, 8.507059e+37 }
 0x3e9   :  { %v1062_v0 = vmul.f32 %v1520_v42, %v1061_v49  ;;  %v863_v2 = vadd.f32 %v1871_v59, %v862_v63 }
 0x3eb   :  { %v1522_v3 = vpop.eup %1521  ;;  %v1063_v4 = vadd.f32 %v1520_v42, %v1062_v0  ;;  %v1371_v5 = vmul.f32 -1.442695, %v863_v2 }
 0x3ec   :  { %v1524_v6 = vpop.eup %1523  ;;  %v933_v8 = vadd.f32 1.0, %v1522_v3 }
 0x3ed   :  { %v1067_v9 = vsel %vm1066_vm2, %v1520_v42, %v1063_v4  ;;  %v1075_v10 = vmul.f32 %v1524_v6, %v932_v44  ;;  %1525 = vpow2.f32 %v1371_v5  ;;  %vm1080_vm4 = vweird.f32 %v1524_v6 }
 0x3ee   :  { %v1072_v11 = vsel %vm1069_vm3, %v1071_v7, %v1067_v9  ;;  %1527 = vrcp.f32 %v933_v8  ;;  %vm1081_vm6 = vmor %vm1079_vm5, %vm1080_vm4  ;;  %v1100_v28 = vand.u32 2147483648, %v933_v8  ;;  %v1098_v31 = vand.u32 2147483647, %v933_v8 }
 0x3ef   :  { %1187 = vst [vmem:[#allocation10 + $0x40] sm:$0xff] %v1072_v11  ;;  %v1076_v12 = vsub.f32 1.0, %v1075_v10  ;;  %vm1094_vm9 = vweird.f32 %v933_v8 }
 0x3f0   :  { %v865_v14 = vpop.f32.mrf.mxu3  ;;  %v1101_v37 = vor.u32 1.1754944e-38, %v1100_v28  ;;  %vm1099_vm11 = vcmp.eq.f32.partialorder %v1098_v31, 8.507059e+37 }
 0x3f1   :  { %v1077_v15 = vmul.f32 %v1524_v6, %v1076_v12  ;;  %v866_v17 = vadd.f32 %v1871_v59, %v865_v14 }
 0x3f3   :  { %v1526_v18 = vpop.eup %1525  ;;  %v1078_v19 = vadd.f32 %v1524_v6, %v1077_v15  ;;  %v1372_v20 = vmul.f32 -1.442695, %v866_v17 }
 0x3f4   :  { %v1528_v21 = vpop.eup %1527  ;;  %v934_v23 = vadd.f32 1.0, %v1526_v18 }
 0x3f5   :  { %v1082_v24 = vsel %vm1081_vm6, %v1524_v6, %v1078_v19  ;;  %v1090_v25 = vmul.f32 %v1528_v21, %v933_v8  ;;  %1529 = vpow2.f32 %v1372_v20  ;;  %vm1095_vm8 = vweird.f32 %v1528_v21 }
 0x3f6   :  { %v1087_v26 = vsel %vm1084_vm7, %v1086_v22, %v1082_v24  ;;  %1531 = vrcp.f32 %v934_v23  ;;  %vm1096_vm10 = vmor %vm1094_vm9, %vm1095_vm8  ;;  %v1115_v51 = vand.u32 2147483648, %v934_v23  ;;  %v1113_v55 = vand.u32 2147483647, %v934_v23 }
 0x3f7   :  { %1188 = vst [vmem:[#allocation10 + $0x48] sm:$0xff] %v1087_v26  ;;  %v1091_v27 = vsub.f32 1.0, %v1090_v25  ;;  %vm1109_vm13 = vweird.f32 %v934_v23 }
 0x3f8   :  { %v867_v29 = vpop.f32.mrf.mxu3  ;;  %v1116_v41 = vor.u32 1.1754944e-38, %v1115_v51  ;;  %vm1114_vm15 = vcmp.eq.f32.partialorder %v1113_v55, 8.507059e+37 }
 0x3f9   :  { %v1092_v30 = vmul.f32 %v1528_v21, %v1091_v27  ;;  %v868_v32 = vadd.f32 %v1871_v59, %v867_v29 }
 0x3fb   :  { %v1530_v33 = vpop.eup %1529  ;;  %v1093_v34 = vadd.f32 %v1528_v21, %v1092_v30  ;;  %v1373_v35 = vmul.f32 -1.442695, %v868_v32 }
 0x3fc   :  { %v1532_v36 = vpop.eup %1531  ;;  %v935_v38 = vadd.f32 1.0, %v1530_v33 }
 0x3fd   :  { %v1097_v39 = vsel %vm1096_vm10, %v1528_v21, %v1093_v34  ;;  %v1105_v47 = vmul.f32 %v1532_v36, %v934_v23  ;;  %1533 = vpow2.f32 %v1373_v35  ;;  %vm1110_vm12 = vweird.f32 %v1532_v36 }
 0x3fe   :  { %v1102_v48 = vsel %vm1099_vm11, %v1101_v37, %v1097_v39  ;;  %1535 = vrcp.f32 %v935_v38  ;;  %vm1111_vm14 = vmor %vm1109_vm13, %vm1110_vm12  ;;  %v1130_v45 = vand.u32 2147483648, %v935_v38  ;;  %v1128_v62 = vand.u32 2147483647, %v935_v38 }
 0x3ff   :  { %1189 = vst [vmem:[#allocation10 + $0x50] sm:$0xff] %v1102_v48  ;;  %v1106_v50 = vsub.f32 1.0, %v1105_v47  ;;  %vm1124_vm1 = vweird.f32 %v935_v38 }
 0x400   :  { %v870_v52 = vpop.f32.mrf.mxu3  ;;  %v1131_v4 = vor.u32 1.1754944e-38, %v1130_v45  ;;  %vm1129_vm3 = vcmp.eq.f32.partialorder %v1128_v62, 8.507059e+37 }
 0x401   :  { %v1107_v53 = vmul.f32 %v1532_v36, %v1106_v50  ;;  %v871_v56 = vadd.f32 %v1871_v59, %v870_v52 }
 0x403   :  { %v1534_v57 = vpop.eup %1533  ;;  %v1108_v54 = vadd.f32 %v1532_v36, %v1107_v53  ;;  %v1374_v58 = vmul.f32 -1.442695, %v871_v56 }
 0x404   :  { %v1536_v40 = vpop.eup %1535  ;;  %v936_v60 = vadd.f32 1.0, %v1534_v57 }
 0x405   :  { %v1112_v42 = vsel %vm1111_vm14, %v1532_v36, %v1108_v54  ;;  %v1120_v43 = vmul.f32 %v1536_v40, %v935_v38  ;;  %1537 = vpow2.f32 %v1374_v58  ;;  %vm1125_vm0 = vweird.f32 %v1536_v40 }
 0x406   :  { %v1117_v44 = vsel %vm1114_vm15, %v1116_v41, %v1112_v42  ;;  %1539 = vrcp.f32 %v936_v60  ;;  %vm1126_vm2 = vmor %vm1124_vm1, %vm1125_vm0  ;;  %v1145_v10 = vand.u32 2147483648, %v936_v60  ;;  %vm1139_vm5 = vweird.f32 %v936_v60 }
 0x407   :  { %1190 = vst [vmem:[#allocation10 + $0x58] sm:$0xff] %v1117_v44  ;;  %v1121_v61 = vsub.f32 1.0, %v1120_v43 }
 0x408   :  { %v872_v46 = vpop.f32.mrf.mxu3  ;;  %v1146_v15 = vor.u32 1.1754944e-38, %v1145_v10 }
 0x409   :  { %v1122_v49 = vmul.f32 %v1536_v40, %v1121_v61  ;;  %v873_v63 = vadd.f32 %v1871_v59, %v872_v46  ;;  %v1143_v59 = vand.u32 2147483647, %v936_v60 }
 0x40b   :  { %v1538_v0 = vpop.eup %1537  ;;  %v1123_v1 = vadd.f32 %v1536_v40, %v1122_v49  ;;  %v1375_v2 = vmul.f32 -1.442695, %v873_v63  ;;  %vm1144_vm7 = vcmp.eq.f32.partialorder %v1143_v59, 8.507059e+37 }
 0x40c   :  { %v1540_v3 = vpop.eup %1539  ;;  %v937_v5 = vadd.f32 1.0, %v1538_v0 }
 0x40d   :  { %v1127_v6 = vsel %vm1126_vm2, %v1536_v40, %v1123_v1  ;;  %v1135_v7 = vmul.f32 %v1540_v3, %v936_v60  ;;  %1541 = vpow2.f32 %v1375_v2  ;;  %vm1140_vm4 = vweird.f32 %v1540_v3 }
 0x40e   :  { %v1132_v8 = vsel %vm1129_vm3, %v1131_v4, %v1127_v6  ;;  %1543 = vrcp.f32 %v937_v5  ;;  %vm1141_vm6 = vmor %vm1139_vm5, %vm1140_vm4  ;;  %v1160_v21 = vand.u32 2147483648, %v937_v5  ;;  %v1158_v23 = vand.u32 2147483647, %v937_v5 }
 0x40f   :  { %1191 = vst [vmem:[#allocation10 + $0x60] sm:$0xff] %v1132_v8  ;;  %v1136_v9 = vsub.f32 1.0, %v1135_v7  ;;  %vm1154_vm9 = vweird.f32 %v937_v5 }
 0x410   :  { %v1161_v26 = vor.u32 1.1754944e-38, %v1160_v21  ;;  %vm1159_vm11 = vcmp.eq.f32.partialorder %v1158_v23, 8.507059e+37 }
 0x411   :  { %v1137_v11 = vmul.f32 %v1540_v3, %v1136_v9 }
 0x413   :  { %v1542_v12 = vpop.eup %1541  ;;  %v1138_v13 = vadd.f32 %v1540_v3, %v1137_v11 }
 0x414   :  { %v1544_v14 = vpop.eup %1543  ;;  %v938_v16 = vadd.f32 1.0, %v1542_v12 }
 0x415   :  { %v1142_v17 = vsel %vm1141_vm6, %v1540_v3, %v1138_v13  ;;  %v1150_v18 = vmul.f32 %v1544_v14, %v937_v5  ;;  %vm1155_vm8 = vweird.f32 %v1544_v14 }
 0x416   :  { %v1147_v19 = vsel %vm1144_vm7, %v1146_v15, %v1142_v17  ;;  %1545 = vrcp.f32 %v938_v16  ;;  %vm1156_vm10 = vmor %vm1154_vm9, %vm1155_vm8  ;;  %v1175_v31 = vand.u32 2147483648, %v938_v16  ;;  %v1173_v33 = vand.u32 2147483647, %v938_v16 }
 0x417   :  { %1192 = vst [vmem:[#allocation10 + $0x68] sm:$0xff] %v1147_v19  ;;  %v1151_v20 = vsub.f32 1.0, %v1150_v18  ;;  %vm1169_vm13 = vweird.f32 %v938_v16 }
 0x418   :  { %v1176_v35 = vor.u32 1.1754944e-38, %v1175_v31  ;;  %vm1174_vm15 = vcmp.eq.f32.partialorder %v1173_v33, 8.507059e+37 }
 0x419   :  { %v1152_v22 = vmul.f32 %v1544_v14, %v1151_v20 }
 0x41b   :  { %v1153_v24 = vadd.f32 %v1544_v14, %v1152_v22 }
 0x41c   :  { %v1546_v25 = vpop.eup %1545 }
 0x41d   :  { %v1157_v27 = vsel %vm1156_vm10, %v1544_v14, %v1153_v24  ;;  %v1165_v28 = vmul.f32 %v1546_v25, %v938_v16  ;;  %vm1170_vm12 = vweird.f32 %v1546_v25 }
 0x41e   :  { %v1162_v29 = vsel %vm1159_vm11, %v1161_v26, %v1157_v27  ;;  %vm1171_vm14 = vmor %vm1169_vm13, %vm1170_vm12 }
 0x41f   :  { %1193 = vst [vmem:[#allocation10 + $0x70] sm:$0xff] %v1162_v29  ;;  %v1166_v30 = vsub.f32 1.0, %v1165_v28 }
 0x421   :  { %v1167_v32 = vmul.f32 %v1546_v25, %v1166_v30 }
 0x423   :  { %v1168_v34 = vadd.f32 %v1546_v25, %v1167_v32 }
 0x425   :  { %v1172_v36 = vsel %vm1171_vm14, %v1546_v25, %v1168_v34 }
 0x426   :  { %v1177_v37 = vsel %vm1174_vm15, %v1176_v35, %v1172_v36 }
 0x427   :  { %1194 = vst [vmem:[#allocation10 + $0x78] sm:$0xff] %v1177_v37 }
 0x428   :  { %1207 = dma.vmem_to_hbm [thread:$0]  %s1200_s18, 2048, %s1202_s21, [#allocation4], %s1682_s22, %s1682_s22, %s1683_s23  }
 0x429   :  { %1673 = dma.done.wait [#allocation4], 2048  }
 0x42a   :  { %1674 = vsyncadd [#allocation4], 4294965248 }
 0x42b   :  { %1212 = vsyncpa [#allocation3], 1 }
 0x42c   :  { %1213 = vsyncpa [#allocation6], 1 }
 0x42d   :  { %1214 = vsyncpa [#allocation9], 1 }
 0x42e   :  { %1215 = vsyncpa [#allocation4], 1 }

</bundles_post_ra>
